<compile_context>
chip_gen: v7x
topology: tpu7x:2x2x1
jax: 0.10.0
libtpu: 0.0.40
codegen_flags: <defaults>
</compile_context>

<pallas_src>
import jax
import jax.numpy as jnp
from jax.experimental import pallas as pl
from jax.experimental.pallas import tpu as pltpu


def _round_up(x: int, m: int) -> int:
    return ((x + m - 1) // m) * m


def _sublane_multiple(dtype) -> int:
    # Minimum second-to-last-dim tile granularity for the given dtype.
    return max(8, 32 // jnp.dtype(dtype).itemsize)  # f32->8, bf16->16, int8->32


def _detect_tpu():
    """Returns (vmem_capacity_bytes, is_multi_tensorcore_chip)."""
    kind = ""
    try:
        kind = jax.devices()[0].device_kind.lower()
    except Exception:
        pass
    is_v7 = "7" in kind  # v7x: 2 TensorCores / chip, 64 MiB VMEM per TC
    vmem_cap = None
    try:
        vmem_cap = int(pltpu.get_tpu_info().vmem_capacity_bytes)
    except Exception:
        vmem_cap = None
    if not vmem_cap or vmem_cap <= 0:
        vmem_cap = (64 << 20) if is_v7 else (128 << 20)
    return vmem_cap, is_v7


def mlp_kernel(x_ref, w1_ref, b1_ref, w2_ref, b2_ref, o_ref):
    # Layer 1: MXU matmul with f32 accumulation; bias + ReLU on the VPU in f32.
    h = jnp.dot(x_ref[...], w1_ref[...], preferred_element_type=jnp.float32)
    h = jnp.maximum(h + b1_ref[...].astype(jnp.float32), 0.0)
    # Layer 2: cast only the matmul operand to the weight dtype; f32 accumulation.
    o = jnp.dot(h.astype(w2_ref.dtype), w2_ref[...],
                preferred_element_type=jnp.float32)
    o = jnp.maximum(o + b2_ref[...].astype(jnp.float32), 0.0)
    o_ref[...] = o.astype(o_ref.dtype)


def prepare_params(w1, b1, w2, b2, *, matmul_dtype=None):
    """Pad feature dims to multiples of 128 and cast matmul operands, ONCE.

    Zero padding is exact: padded hidden columns are ReLU(0+0)=0 and the padded
    w2 rows multiply those zeros.  Call this at parameter-creation time so the
    pads/casts are not re-executed on every forward pass.
    """
    in_f, h1 = w1.shape
    out_f = w2.shape[1]
    h1_p = _round_up(h1, 128)
    out_p = _round_up(out_f, 128)
    compute_dtype = (jnp.dtype(matmul_dtype) if matmul_dtype is not None
                     else jnp.dtype(w1.dtype))
    w1p = jnp.pad(w1, ((0, 0), (0, h1_p - h1))).astype(compute_dtype)
    b1p = jnp.pad(jnp.reshape(b1, (1, -1)), ((0, 0), (0, h1_p - h1))).astype(jnp.float32)
    w2p = jnp.pad(w2, ((0, h1_p - h1), (0, out_p - out_f))).astype(compute_dtype)
    b2p = jnp.pad(jnp.reshape(b2, (1, -1)), ((0, 0), (0, out_p - out_f))).astype(jnp.float32)
    return {"w1": w1p, "b1": b1p, "w2": w2p, "b2": b2p,
            "in_f": in_f, "out_f": out_f, "compute_dtype": compute_dtype}


def _const_block_spec(block_shape):
    # Constant-index blocks (weights / biases) do not need double buffering.
    try:
        return pl.BlockSpec(block_shape, lambda i: (0, 0),
                            pipeline_mode=pl.Buffered(1))
    except Exception:
        return pl.BlockSpec(block_shape, lambda i: (0, 0))


def fullyconnected_forward(x, params, *, batch_tile=256):
    """Fused two-layer MLP forward.  `params` comes from prepare_params()."""
    B, in_f = x.shape
    assert in_f == params["in_f"]
    w1p, b1p, w2p, b2p = params["w1"], params["b1"], params["w2"], params["b2"]
    out_f = params["out_f"]
    compute_dtype = params["compute_dtype"]
    h1_p = w1p.shape[1]
    out_p = w2p.shape[1]
    out_dtype = x.dtype

    vmem_cap, is_v7 = _detect_tpu()
    vmem_budget = int(0.65 * vmem_cap)          # ~42 MiB on v7x, ~83 MiB on v5e/v6e

    x_c = x if x.dtype == compute_dtype else x.astype(compute_dtype)
    isz = jnp.dtype(compute_dtype).itemsize
    osz = jnp.dtype(out_dtype).itemsize
    sub = _sublane_multiple(compute_dtype)

    def vmem_need(bt_):
        n = 0
        n += 2 * bt_ * in_f * isz          # x tile (double-buffered)
        n += 2 * bt_ * out_p * osz         # out tile (double-buffered)
        n += in_f * h1_p * isz             # w1 (resident, single buffer)
        n += h1_p * out_p * isz            # w2 (resident, single buffer)
        n += (h1_p + out_p) * 4            # biases
        n += bt_ * (h1_p + out_p) * 4      # f32 intermediates
        return n

    # Largest batch tile that fits the budget (and covers B).
    bt_max = max(sub, min(_round_up(batch_tile, sub), _round_up(B, sub)))
    while bt_max > sub and vmem_need(bt_max) > vmem_budget:
        bt_max = max(sub, _round_up(bt_max // 2, sub))

    # TODO(synk): for very large in_f / h1 the weights no longer fit VMEM even
    # with bt == sub; add a K-reduction grid axis ("arbitrary", f32 accumulator).

    num_steps = max(1, -(-B // bt_max))
    if is_v7 and num_steps < 2 and B > sub:
        num_steps = 2                       # give both v7x TensorCores work
    # Balance tiles so the last one is nearly full (bounds padding waste).
    bt = _round_up(max(1, -(-B // num_steps)), sub)
    num_steps = max(1, -(-B // bt))
    Bp = bt * num_steps
    if Bp != B:
        x_c = jnp.pad(x_c, ((0, Bp - B), (0, 0)))

    # Only CORE_PARALLEL actually shards grid steps across the two v7x cores;
    # on single-TC chips the grid is a serial loop and the annotation is moot.
    if is_v7 and num_steps >= 2:
        dim_sem = (getattr(pltpu, "CORE_PARALLEL", "parallel"),)
    else:
        dim_sem = ("arbitrary",)

    flops = 2 * Bp * (in_f * h1_p + h1_p * out_p)
    bytes_accessed = (Bp * in_f * isz + in_f * h1_p * isz + h1_p * 4
                      + h1_p * out_p * isz + out_p * 4 + Bp * out_p * osz)
    cost = pl.CostEstimate(flops=flops, transcendentals=0,
                           bytes_accessed=bytes_accessed)

    out_padded = pl.pallas_call(
        mlp_kernel,
        out_shape=jax.ShapeDtypeStruct((Bp, out_p), out_dtype),
        grid_spec=pltpu.PrefetchScalarGridSpec(
            num_scalar_prefetch=0,
            grid=(num_steps,),
            in_specs=[
                pl.BlockSpec((bt, in_f), lambda i: (i, 0)),   # x tile
                _const_block_spec((in_f, h1_p)),              # w1 (resident)
                _const_block_spec((1, h1_p)),                 # b1
                _const_block_spec((h1_p, out_p)),             # w2 (resident)
                _const_block_spec((1, out_p)),                # b2
            ],
            out_specs=pl.BlockSpec((bt, out_p), lambda i: (i, 0)),
        ),
        compiler_params=pltpu.CompilerParams(
            dimension_semantics=dim_sem,
            vmem_limit_bytes=int(max(vmem_budget, 32 << 20)),
        ),
        cost_estimate=cost,
    )(x_c, w1p, b1p, w2p, b2p)

    return out_padded[:B, :out_f]


def fullyconnected(x, w1, b1, w2, b2, *, batch_tile=256, matmul_dtype=None):
    """One-shot convenience wrapper (prefer prepare_params once + forward)."""
    params = prepare_params(w1, b1, w2, b2, matmul_dtype=matmul_dtype)
    return fullyconnected_forward(x, params, batch_tile=batch_tile)


if __name__ == "__main__":
    # Shapes consistent with fullyconnected(input_size=32, hidden1=64, output_size=16).
    batch, input_size, hidden1, output_size = 256, 32, 64, 16

    key = jax.random.PRNGKey(0)
    kx, kw1, kb1, kw2, kb2 = jax.random.split(key, 5)

    x = jax.random.normal(kx, (batch, input_size), dtype=jnp.float32)
    # PyTorch Linear weight is (out, in); we keep it transposed as (in, out).
    w1 = jax.random.normal(kw1, (input_size, hidden1), dtype=jnp.float32) * 0.1
    b1 = jax.random.normal(kb1, (hidden1,), dtype=jnp.float32) * 0.1
    w2 = jax.random.normal(kw2, (hidden1, output_size), dtype=jnp.float32) * 0.1
    b2 = jax.random.normal(kb2, (output_size,), dtype=jnp.float32) * 0.1

    # Pad / cast parameters ONCE (hoisted out of the per-call path).
    # matmul_dtype=None keeps pure f32 == exact PyTorch semantics; pass
    # jnp.bfloat16 to halve HBM bytes when the accuracy budget allows.
    params = prepare_params(w1, b1, w2, b2, matmul_dtype=None)

    out = fullyconnected_forward(x, params)
    out = jax.block_until_ready(out)

    # Pure-JAX reference (same semantics as the PyTorch forward, f32 throughout).
    ref = jnp.maximum(x @ w1 + b1[None, :], 0.0)
    ref = jnp.maximum(ref @ w2 + b2[None, :], 0.0)
    assert out.shape == (batch, output_size)
    assert jnp.allclose(out, ref, atol=1e-4, rtol=1e-4), float(jnp.max(jnp.abs(out - ref)))

    print("KERNEL_OK")
</pallas_src>

<mosaic_0001>
module attributes {stable_mosaic.version = 11 : i64} {
  func.func @mlp_kernel(%arg0: i32, %arg1: memref<256x32xf32, #tpu.memory_space<vmem>>, %arg2: memref<32x128xf32, #tpu.memory_space<vmem>>, %arg3: memref<1x128xf32, #tpu.memory_space<vmem>>, %arg4: memref<128x128xf32, #tpu.memory_space<vmem>>, %arg5: memref<1x128xf32, #tpu.memory_space<vmem>>, %arg6: memref<256x128xf32, #tpu.memory_space<vmem>>) attributes {dimension_semantics = [#tpu.dimension_semantics<arbitrary>], iteration_bounds = array<i64: 1>, scalar_prefetch = 0 : i64, scratch_operands = 0 : i64, tpu.core_type = #tpu.core_type<tc>, window_params = [{transform_indices = @transform_0, window_bounds = array<i64: 256, 32>}, {pipeline_mode = #tpu.pipeline_mode<synchronous>, transform_indices = @transform_1, window_bounds = array<i64: 32, 128>}, {pipeline_mode = #tpu.pipeline_mode<synchronous>, transform_indices = @transform_2, window_bounds = array<i64: 1, 128>}, {pipeline_mode = #tpu.pipeline_mode<synchronous>, transform_indices = @transform_3, window_bounds = array<i64: 128, 128>}, {pipeline_mode = #tpu.pipeline_mode<synchronous>, transform_indices = @transform_4, window_bounds = array<i64: 1, 128>}, {transform_indices = @transform_5, window_bounds = array<i64: 256, 128>}]} {
    %c0 = arith.constant 0 : index
    %c0_0 = arith.constant 0 : index
    %0 = vector.load %arg1[%c0, %c0_0] : memref<256x32xf32, #tpu.memory_space<vmem>>, vector<256x32xf32>
    %c0_1 = arith.constant 0 : index
    %c0_2 = arith.constant 0 : index
    %1 = vector.load %arg2[%c0_1, %c0_2] : memref<32x128xf32, #tpu.memory_space<vmem>>, vector<32x128xf32>
    %cst = arith.constant dense<0.000000e+00> : vector<256x128xf32>
    %2 = tpu.matmul %0, %1, %cst {dimension_numbers = #tpu.dot_dimension_numbers<[1], [0], [0], [1], [0, 0, 1, 1], [], []>} : vector<256x32xf32>, vector<32x128xf32>, vector<256x128xf32> -> vector<256x128xf32>
    %c0_3 = arith.constant 0 : index
    %c0_4 = arith.constant 0 : index
    %3 = vector.load %arg3[%c0_3, %c0_4] : memref<1x128xf32, #tpu.memory_space<vmem>>, vector<1x128xf32>
    %4 = vector.broadcast %3 : vector<1x128xf32> to vector<256x128xf32>
    %5 = arith.addf %2, %4 : vector<256x128xf32>
    %cst_5 = arith.constant 0.000000e+00 : f32
    %6 = vector.broadcast %cst_5 : f32 to vector<256x128xf32>
    %7 = arith.maximumf %5, %6 : vector<256x128xf32>
    %c0_6 = arith.constant 0 : index
    %c0_7 = arith.constant 0 : index
    %8 = vector.load %arg4[%c0_6, %c0_7] : memref<128x128xf32, #tpu.memory_space<vmem>>, vector<128x128xf32>
    %cst_8 = arith.constant dense<0.000000e+00> : vector<256x128xf32>
    %9 = tpu.matmul %7, %8, %cst_8 {dimension_numbers = #tpu.dot_dimension_numbers<[1], [0], [0], [1], [0, 0, 1, 1], [], []>} : vector<256x128xf32>, vector<128x128xf32>, vector<256x128xf32> -> vector<256x128xf32>
    %c0_9 = arith.constant 0 : index
    %c0_10 = arith.constant 0 : index
    %10 = vector.load %arg5[%c0_9, %c0_10] : memref<1x128xf32, #tpu.memory_space<vmem>>, vector<1x128xf32>
    %11 = vector.broadcast %10 : vector<1x128xf32> to vector<256x128xf32>
    %12 = arith.addf %9, %11 : vector<256x128xf32>
    %cst_11 = arith.constant 0.000000e+00 : f32
    %13 = vector.broadcast %cst_11 : f32 to vector<256x128xf32>
    %14 = arith.maximumf %12, %13 : vector<256x128xf32>
    %c0_12 = arith.constant 0 : index
    %c0_13 = arith.constant 0 : index
    %15 = vector.load %arg6[%c0_12, %c0_13] : memref<256x128xf32, #tpu.memory_space<vmem>>, vector<256x128xf32>
    tpu.vector_store %arg6[%c0_12, %c0_13], %14 {strides = array<i32>} : memref<256x128xf32, #tpu.memory_space<vmem>>, vector<256x128xf32>,
    return
  }
  func.func @transform_0(%arg0: i32) -> (i32, i32) {
    %c0_i32 = arith.constant 0 : i32
    %c0_i32_0 = arith.constant 0 : i32
    return %arg0, %c0_i32 : i32, i32
  }
  func.func @transform_1(%arg0: i32) -> (i32, i32) {
    %c0_i32 = arith.constant 0 : i32
    %c0_i32_0 = arith.constant 0 : i32
    %c0_i32_1 = arith.constant 0 : i32
    return %c0_i32, %c0_i32_0 : i32, i32
  }
  func.func @transform_2(%arg0: i32) -> (i32, i32) {
    %c0_i32 = arith.constant 0 : i32
    %c0_i32_0 = arith.constant 0 : i32
    %c0_i32_1 = arith.constant 0 : i32
    return %c0_i32, %c0_i32_0 : i32, i32
  }
  func.func @transform_3(%arg0: i32) -> (i32, i32) {
    %c0_i32 = arith.constant 0 : i32
    %c0_i32_0 = arith.constant 0 : i32
    %c0_i32_1 = arith.constant 0 : i32
    return %c0_i32, %c0_i32_0 : i32, i32
  }
  func.func @transform_4(%arg0: i32) -> (i32, i32) {
    %c0_i32 = arith.constant 0 : i32
    %c0_i32_0 = arith.constant 0 : i32
    %c0_i32_1 = arith.constant 0 : i32
    return %c0_i32, %c0_i32_0 : i32, i32
  }
  func.func @transform_5(%arg0: i32) -> (i32, i32) {
    %c0_i32 = arith.constant 0 : i32
    %c0_i32_0 = arith.constant 0 : i32
    return %arg0, %c0_i32 : i32, i32
  }
}

</mosaic_0001>

<bundles_post_ra>
// kernel: tpu_custom_call.1
= control target key start
LH: loop header
LB: loop body
LE: loop exit
PB: predicated region body
PF: predicated region fallthrough
CT: control target
= control target key end

     0   :  { %10 = vsyncpa [#allocation3], 0  ;;  %s1500_s0 = inlined_call_operand.hbm [shape: f32[256,32], index: 0, kind: input, shape index: {}]   ;;  %s1501_s1 = inlined_call_operand.hbm [shape: f32[32,128], index: 1, kind: input, shape index: {}]   ;;  %s1502_s2 = inlined_call_operand.hbm [shape: f32[1,128], index: 2, kind: input, shape index: {}]   ;;  %s1503_s3 = inlined_call_operand.hbm [shape: f32[128,128], index: 3, kind: input, shape index: {}]   ;;  %s1504_s4 = inlined_call_operand.hbm [shape: f32[1,128], index: 4, kind: input, shape index: {}]   ;;  %s1505_s5 = inlined_call_operand.hbm [shape: f32[256,128], index: 5, kind: output, shape index: {}]  }
   0x1   :  { %11 = vsyncpa [#allocation6], 0 }
   0x2   :  { %12 = vsyncpa [#allocation9], 0 }
   0x3   :  { %13 = vsyncpa [#allocation4], 0  ;;  %s1271_s18 = smov [#allocation5]   ;;  %s1272_s20 = smov [#allocation8]  }
   0x4   :  { %s31_s19 = sshll.u32 %s1271_s18, 4  ;;  %s53_s21 = sshll.u32 %s1272_s20, 4  ;;  %s32_s19 = int_to_ptr.vmem [resolvable:$true] %s31_s19  ;;  %s1309_s21 = int_to_ptr.vmem [resolvable:$true] %s53_s21 }
   0x5   :  { %s1131_s24 = scalar_lea.hbm %s1501_s1, 512 }
   0x6   :  { %p1132_p0 = scmp.ne.s32.totalorder %s1501_s1, %s1131_s24  ;;  %p1135_p1 = scmp.lt.u32.totalorder %s1131_s24, %s1501_s1 }
   0x8   :  { %p1137_p2 = pnand %p1135_p1, %p1132_p0 }
   0xa   :  { %1140 = shalt.err (!%p1137_p2)
}
   0xb   :  { %s1141_s29 = scalar_lea.vmem %s32_s19, 512  ;;  %p1146_p4 = scmp.lt.s32.totalorder %s32_s19, %s32_s19 }
   0xc   :  { %p1142_p3 = scmp.ne.s32.totalorder %s32_s19, %s1141_s29  ;;  %p1147_p5 = scmp.lt.s32.totalorder %s1141_s29, %s1141_s29 }
   0xe   :  { %p1148_p6 = por %p1147_p5, %p1146_p4 }
  0x10   :  { %p1149_p7 = pnand %p1148_p6, %p1142_p3 }
  0x12   :  { %1152 = shalt.err (!%p1149_p7)
}
  0x13   :  { %s1273_s30 = smov 128   ;;  %s1274_s6 = smov 8  }
  0x14   :  { %37 = dma.hbm_to_vmem [thread:$0]  %s1501_s1, 512, %s32_s19, [#allocation6], %s1273_s30, %s1273_s30, %s1274_s6  }
  0x15   :  { %s1153_s11 = scalar_lea.hbm %s1503_s3, 2048 }
  0x16   :  { %p1154_p8 = scmp.ne.s32.totalorder %s1503_s3, %s1153_s11  ;;  %p1157_p9 = scmp.lt.u32.totalorder %s1153_s11, %s1503_s3 }
  0x18   :  { %p1159_p10 = pnand %p1157_p9, %p1154_p8 }
  0x1a   :  { %1162 = shalt.err (!%p1159_p10)
}
  0x1b   :  { %s1163_s16 = scalar_lea.vmem %s1309_s21, 2048  ;;  %p1168_p12 = scmp.lt.s32.totalorder %s1309_s21, %s1309_s21 }
  0x1c   :  { %p1164_p11 = scmp.ne.s32.totalorder %s1309_s21, %s1163_s16  ;;  %p1169_p13 = scmp.lt.s32.totalorder %s1163_s16, %s1163_s16 }
  0x1e   :  { %p1170_p0 = por %p1169_p13, %p1168_p12 }
  0x20   :  { %p1171_p1 = pnand %p1170_p0, %p1164_p11 }
  0x22   :  { %1174 = shalt.err (!%p1171_p1)
}
  0x23   :  { %59 = dma.hbm_to_vmem [thread:$0]  %s1503_s3, 2048, %s1309_s21, [#allocation9], %s1273_s30, %s1273_s30, %s1274_s6  }
  0x24   :  { %s1275_s18 = smov [#allocation2]   ;;  %s1276_s20 = smov [#allocation7]  }
  0x25   :  { %s19_s19 = sshll.u32 %s1275_s18, 4  ;;  %s44_s22 = sshll.u32 %s1276_s20, 4  ;;  %s20_s19 = int_to_ptr.vmem [resolvable:$true] %s19_s19  ;;  %s45_s22 = int_to_ptr.vmem [resolvable:$true] %s44_s22 }
  0x26   :  { %s1175_s25 = scalar_lea.hbm %s1500_s0, 4096 }
  0x27   :  { %p1176_p2 = scmp.ne.s32.totalorder %s1500_s0, %s1175_s25  ;;  %p1179_p3 = scmp.lt.u32.totalorder %s1175_s25, %s1500_s0 }
  0x29   :  { %p1181_p4 = pnand %p1179_p3, %p1176_p2 }
  0x2b   :  { %1184 = shalt.err (!%p1181_p4)
}
  0x2c   :  { %s1185_s3 = scalar_lea.vmem %s20_s19, 4096  ;;  %p1190_p6 = scmp.lt.s32.totalorder %s20_s19, %s20_s19 }
  0x2d   :  { %p1186_p5 = scmp.ne.s32.totalorder %s20_s19, %s1185_s3  ;;  %p1191_p7 = scmp.lt.s32.totalorder %s1185_s3, %s1185_s3 }
  0x2f   :  { %p1192_p8 = por %p1191_p7, %p1190_p6 }
  0x31   :  { %p1193_p9 = pnand %p1192_p8, %p1186_p5 }
  0x33   :  { %1196 = shalt.err (!%p1193_p9)
}
  0x34   :  { %25 = dma.hbm_to_vmem [thread:$0]  %s1500_s0, 4096, %s20_s19, [#allocation3], %s1273_s30, %s1273_s30, %s1274_s6  }
  0x35   :  { %s1197_s10 = scalar_lea.hbm %s1502_s2, 16 }
  0x36   :  { %p1198_p10 = scmp.ne.s32.totalorder %s1502_s2, %s1197_s10  ;;  %p1201_p11 = scmp.lt.u32.totalorder %s1197_s10, %s1502_s2 }
  0x38   :  { %p1203_p12 = pnand %p1201_p11, %p1198_p10 }
  0x3a   :  { %1206 = shalt.err (!%p1203_p12)
}
  0x3b   :  { %s1207_s15 = scalar_lea.vmem %s45_s22, 16  ;;  %s1211_s16 = scalar_lea.vmem %s45_s22, 32 }
  0x3c   :  { %p1208_p13 = scmp.ne.s32.totalorder %s45_s22, %s1207_s15  ;;  %p1212_p0 = scmp.lt.s32.totalorder %s45_s22, %s45_s22 }
  0x3d   :  { %p1213_p1 = scmp.lt.s32.totalorder %s1211_s16, %s1207_s15 }
  0x3f   :  { %p1214_p2 = por %p1213_p1, %p1212_p0 }
  0x41   :  { %p1215_p3 = pnand %p1214_p2, %p1208_p13 }
  0x43   :  { %1218 = shalt.err (!%p1215_p3)
}
  0x44   :  { %47 = dma.hbm_to_vmem [thread:$0]  %s1502_s2, 16, %s45_s22, [#allocation6]  }
  0x45   :  { %s1277_s17 = smov [#allocation10]   ;;  %s1219_s23 = scalar_lea.hbm %s1504_s4, 16 }
  0x46   :  { %s66_s18 = sshll.u32 %s1277_s17, 4  ;;  %p1220_p4 = scmp.ne.s32.totalorder %s1504_s4, %s1219_s23  ;;  %s67_s18 = int_to_ptr.vmem [resolvable:$true] %s66_s18 }
  0x47   :  { %p1223_p5 = scmp.lt.u32.totalorder %s1219_s23, %s1504_s4 }
  0x49   :  { %p1225_p6 = pnand %p1223_p5, %p1220_p4 }
  0x4b   :  { %1228 = shalt.err (!%p1225_p6)
}
  0x4c   :  { %s1229_s28 = scalar_lea.vmem %s67_s18, 16  ;;  %s1233_s2 = scalar_lea.vmem %s67_s18, 32 }
  0x4d   :  { %p1230_p7 = scmp.ne.s32.totalorder %s67_s18, %s1229_s28  ;;  %p1234_p8 = scmp.lt.s32.totalorder %s67_s18, %s67_s18 }
  0x4e   :  { %p1235_p9 = scmp.lt.s32.totalorder %s1233_s2, %s1229_s28 }
  0x50   :  { %p1236_p10 = por %p1235_p9, %p1234_p8 }
  0x52   :  { %p1237_p11 = pnand %p1236_p10, %p1230_p7 }
  0x54   :  { %1240 = shalt.err (!%p1237_p11)
}
  0x55   :  { %69 = dma.hbm_to_vmem [thread:$0]  %s1504_s4, 16, %s67_s18, [#allocation9]  }
  0x56   :  { %1263 = dma.done.wait [#allocation3], 4096  }
  0x57   :  { %1264 = vsyncadd [#allocation3], 4294963200 }
  0x58   :  { %1265 = dma.done.wait [#allocation6], 528  }
  0x59   :  { %1266 = vsyncadd [#allocation6], 4294966768 }
  0x5a   :  { %1267 = dma.done.wait [#allocation9], 2064  }
  0x5b   :  { %1268 = vsyncadd [#allocation9], 4294965232  ;;  %vm128_vm0 = vcmask 261120   ;;  %v117_v0 = vld [vmem:[#allocation5] sm:$0xff]  ;;  %v118_v1 = vld [vmem:[#allocation5 + $0x8] sm:$0xff]  ;;  %s1278_s4 = smov [#allocation11]  }
  0x5c   :  { %v119_v2 = vld [vmem:[#allocation5 + $0x10] sm:$0xff]  ;;  %v1067_v3 = vpack.c.bf16 %v118_v1, %v117_v0  ;;  %v120_v4 = vld [vmem:[#allocation5 + $0x18] sm:$0xff]  ;;  %v85_v5 = vld [vmem:[#allocation2] sm:$0xff]  ;;  %s799_s3 = sshll.u32 %s1278_s4, 4  ;;  %s800_s3 = int_to_ptr.vmem [resolvable:$true] %s799_s3 }
  0x5d   :  { %v1071_v6 = vpack.c.bf16 %v120_v4, %v119_v2  ;;  %939 = vmatprep.mubr.msk.f32.mxu0 %vm128_vm0, %v85_v5  ;;  %v86_v7 = vld [vmem:[#allocation2 + $0x8] sm:$0xff]  ;;  %v87_v8 = vld [vmem:[#allocation2 + $0x10] sm:$0xff]  ;;  %v88_v9 = vld [vmem:[#allocation2 + $0x18] sm:$0xff]  ;;  %s1241_s21 = scalar_lea.vmem %s800_s3, 4096  ;;  %p1246_p13 = scmp.lt.s32.totalorder %s800_s3, %s800_s3 }
  0x5e   :  { %1068 = vmatprep.subr.bf16.mxu0 %v1067_v3  ;;  %v482_v10 = vld [vmem:[#allocation8] sm:$0xff]  ;;  %v483_v11 = vld [vmem:[#allocation8 + $0x8] sm:$0xff]  ;;  %v484_v12 = vld [vmem:[#allocation8 + $0x10] sm:$0xff]  ;;  %p1242_p12 = scmp.ne.s32.totalorder %s800_s3, %s1241_s21  ;;  %p1247_p0 = scmp.lt.s32.totalorder %s1241_s21, %s1241_s21 }
  0x5f   :  { %1070 = vmatpush3.bf16.msra.mxu0 %v1067_v3  ;;  %v89_v13 = vld [vmem:[#allocation2 + $0x20] sm:$0xff]  ;;  %v1075_v14 = vpack.c.bf16 %v483_v11, %v482_v10  ;;  %v487_v18 = vld [vmem:[#allocation8 + $0x28] sm:$0xff]  ;;  %v488_v22 = vld [vmem:[#allocation8 + $0x30] sm:$0xff] }
  0x60   :  { %1072 = vmatprep.subr.bf16.mxu0 %v1071_v6  ;;  %v485_v15 = vld [vmem:[#allocation8 + $0x18] sm:$0xff]  ;;  %v486_v17 = vld [vmem:[#allocation8 + $0x20] sm:$0xff]  ;;  %v91_v20 = vld [vmem:[#allocation2 + $0x30] sm:$0xff]  ;;  %p1248_p1 = por %p1247_p0, %p1246_p13 }
  0x61   :  { %v1079_v16 = vpack.c.bf16 %v485_v15, %v484_v12  ;;  %v90_v19 = vld [vmem:[#allocation2 + $0x28] sm:$0xff]  ;;  %v1083_v21 = vpack.c.bf16 %v487_v18, %v486_v17  ;;  %1107 = vmatprep.subr.bf16.mxu1 %v1075_v14  ;;  %v489_v23 = vld [vmem:[#allocation8 + $0x38] sm:$0xff]  ;;  %v95_v30 = vld [vmem:[#allocation2 + $0x50] sm:$0xff] }
  0x62   :  { %1115 = vmatpush3.bf16.msra.mxu1 %v1075_v14  ;;  %v92_v24 = vld [vmem:[#allocation2 + $0x38] sm:$0xff]  ;;  %v93_v25 = vld [vmem:[#allocation2 + $0x40] sm:$0xff]  ;;  %v1087_v26 = vpack.c.bf16 %v489_v23, %v488_v22  ;;  %v491_v28 = vld [vmem:[#allocation8 + $0x48] sm:$0xff]  ;;  %p1249_p2 = pnand %p1248_p1, %p1242_p12 }
  0x63   :  { %1074 = vmatpush3.bf16.msra.mxu0 %v1071_v6  ;;  %1108 = vmatprep.subr.bf16.mxu1 %v1079_v16  ;;  %v490_v27 = vld [vmem:[#allocation8 + $0x40] sm:$0xff]  ;;  %v492_v32 = vld [vmem:[#allocation8 + $0x50] sm:$0xff]  ;;  %v493_v33 = vld [vmem:[#allocation8 + $0x58] sm:$0xff] }
  0x64   :  { %1076 = vmatprep.subr.bf16.mxu0 %v1075_v14  ;;  %v94_v29 = vld [vmem:[#allocation2 + $0x48] sm:$0xff]  ;;  %v1091_v31 = vpack.c.bf16 %v491_v28, %v490_v27  ;;  %v96_v34 = vld [vmem:[#allocation2 + $0x58] sm:$0xff]  ;;  %v97_v35 = vld [vmem:[#allocation2 + $0x60] sm:$0xff]  ;;  %v1095_v36 = vpack.c.bf16 %v493_v33, %v492_v32 }
  0x65   :  { %v494_v37 = vld [vmem:[#allocation8 + $0x60] sm:$0xff]  ;;  %v495_v38 = vld [vmem:[#allocation8 + $0x68] sm:$0xff]  ;;  %v100_v42 = vld [vmem:[#allocation2 + $0x78] sm:$0xff] }
  0x66   :  { %940 = vmatmul.mubr.msk.f32.vlgmr.msra.gmra.mrb[0].mxu0 %vm128_vm0, %v86_v7  ;;  %1116 = vmatpush3.bf16.msra.mxu1 %v1079_v16  ;;  %v98_v39 = vld [vmem:[#allocation2 + $0x68] sm:$0xff]  ;;  %v99_v40 = vld [vmem:[#allocation2 + $0x70] sm:$0xff]  ;;  %v1099_v41 = vpack.c.bf16 %v495_v38, %v494_v37  ;;  %v101_v43 = vld [vmem:[#allocation2 + $0x80] sm:$0xff] }
  0x67   :  { %942 = vmatprep.mubr.msk.f32.mxu0 %vm128_vm0, %v87_v8  ;;  %1078 = vmatpush3.bf16.msra.mxu0 %v1075_v14  ;;  %v102_v44 = vld [vmem:[#allocation2 + $0x88] sm:$0xff]  ;;  %v103_v45 = vld [vmem:[#allocation2 + $0x90] sm:$0xff]  ;;  %v104_v46 = vld [vmem:[#allocation2 + $0x98] sm:$0xff] }
  0x68   :  { %1080 = vmatprep.subr.bf16.mxu0 %v1079_v16  ;;  %1109 = vmatprep.subr.bf16.mxu1 %v1083_v21  ;;  %v105_v47 = vld [vmem:[#allocation2 + $0xa0] sm:$0xff]  ;;  %v106_v48 = vld [vmem:[#allocation2 + $0xa8] sm:$0xff]  ;;  %v107_v49 = vld [vmem:[#allocation2 + $0xb0] sm:$0xff] }
  0x69   :  { %v108_v50 = vld [vmem:[#allocation2 + $0xb8] sm:$0xff]  ;;  %v109_v51 = vld [vmem:[#allocation2 + $0xc0] sm:$0xff]  ;;  %v110_v52 = vld [vmem:[#allocation2 + $0xc8] sm:$0xff] }
  0x6a   :  { %943 = vmatmul.mubr.msk.f32.gmra.mrb[2].mxu0 %vm128_vm0, %v88_v9  ;;  %1117 = vmatpush3.bf16.msra.mxu1 %v1083_v21  ;;  %v111_v53 = vld [vmem:[#allocation2 + $0xd0] sm:$0xff]  ;;  %v112_v54 = vld [vmem:[#allocation2 + $0xd8] sm:$0xff]  ;;  %v113_v55 = vld [vmem:[#allocation2 + $0xe0] sm:$0xff] }
  0x6b   :  { %945 = vmatprep.mubr.msk.f32.mxu0 %vm128_vm0, %v89_v13  ;;  %1082 = vmatpush3.bf16.msra.mxu0 %v1079_v16  ;;  %v114_v56 = vld [vmem:[#allocation2 + $0xe8] sm:$0xff]  ;;  %v115_v57 = vld [vmem:[#allocation2 + $0xf0] sm:$0xff]  ;;  %v116_v58 = vld [vmem:[#allocation2 + $0xf8] sm:$0xff] }
  0x6c   :  { %1084 = vmatprep.subr.bf16.mxu0 %v1083_v21  ;;  %1110 = vmatprep.subr.bf16.mxu1 %v1087_v26  ;;  %v496_v59 = vld [vmem:[#allocation8 + $0x70] sm:$0xff]  ;;  %v497_v60 = vld [vmem:[#allocation8 + $0x78] sm:$0xff] }
  0x6d   :  { %v1103_v61 = vpack.c.bf16 %v497_v60, %v496_v59  ;;  %v1417_v62 = vld [vmem:[#allocation7] ss:$0 sm:$0xff] }
  0x6e   :  { %946 = vmatmul.mubr.msk.f32.gmra.mrb[4].mxu0 %vm128_vm0, %v90_v19  ;;  %1118 = vmatpush3.bf16.msra.mxu1 %v1087_v26 }
  0x6f   :  { %948 = vmatprep.mubr.msk.f32.mxu0 %vm128_vm0, %v91_v20  ;;  %1086 = vmatpush3.bf16.msra.mxu0 %v1083_v21 }
  0x70   :  { %1088 = vmatprep.subr.bf16.mxu0 %v1087_v26  ;;  %1111 = vmatprep.subr.bf16.mxu1 %v1091_v31 }
  0x72   :  { %949 = vmatmul.mubr.msk.f32.gmra.mrb[6].mxu0 %vm128_vm0, %v92_v24  ;;  %1119 = vmatpush3.bf16.msra.mxu1 %v1091_v31 }
  0x73   :  { %951 = vmatprep.mubr.msk.f32.mxu0 %vm128_vm0, %v93_v25  ;;  %1090 = vmatpush3.bf16.msra.mxu0 %v1087_v26 }
  0x74   :  { %1092 = vmatprep.subr.bf16.mxu0 %v1091_v31  ;;  %1112 = vmatprep.subr.bf16.mxu1 %v1095_v36 }
  0x76   :  { %952 = vmatmul.mubr.msk.f32.gmra.mrb[8].mxu0 %vm128_vm0, %v94_v29  ;;  %1120 = vmatpush3.bf16.msra.mxu1 %v1095_v36 }
  0x77   :  { %954 = vmatprep.mubr.msk.f32.mxu0 %vm128_vm0, %v95_v30  ;;  %1094 = vmatpush3.bf16.msra.mxu0 %v1091_v31 }
  0x78   :  { %1096 = vmatprep.subr.bf16.mxu0 %v1095_v36  ;;  %1113 = vmatprep.subr.bf16.mxu1 %v1099_v41 }
  0x7a   :  { %955 = vmatmul.mubr.msk.f32.gmra.mrb[10].mxu0 %vm128_vm0, %v96_v34  ;;  %1121 = vmatpush3.bf16.msra.mxu1 %v1099_v41 }
  0x7b   :  { %957 = vmatprep.mubr.msk.f32.mxu0 %vm128_vm0, %v97_v35  ;;  %1098 = vmatpush3.bf16.msra.mxu0 %v1095_v36 }
  0x7c   :  { %1100 = vmatprep.subr.bf16.mxu0 %v1099_v41  ;;  %1114 = vmatprep.subr.bf16.mxu1 %v1103_v61 }
  0x7e   :  { %958 = vmatmul.mubr.msk.f32.gmra.mrb[12].mxu0 %vm128_vm0, %v98_v39  ;;  %1122 = vmatpush3.bf16.msra.mxu1 %v1103_v61 }
  0x7f   :  { %960 = vmatprep.mubr.msk.f32.mxu0 %vm128_vm0, %v99_v40  ;;  %1102 = vmatpush3.bf16.msra.mxu0 %v1099_v41 }
  0x80   :  { %1104 = vmatprep.subr.bf16.mxu0 %v1103_v61 }
  0x82   :  { %961 = vmatmul.mubr.msk.f32.gmra.mrb[14].mxu0 %vm128_vm0, %v100_v42 }
  0x83   :  { %963 = vmatprep.mubr.msk.f32.mxu0 %vm128_vm0, %v101_v43  ;;  %1106 = vmatpush3.bf16.msra.mxu0 %v1103_v61 }
  0x86   :  { %964 = vmatmul.mubr.msk.f32.gmra.mrb[16].mxu0 %vm128_vm0, %v102_v44 }
  0x87   :  { %966 = vmatprep.mubr.msk.f32.mxu0 %vm128_vm0, %v103_v45 }
  0x8a   :  { %967 = vmatmul.mubr.msk.f32.gmra.mrb[18].mxu0 %vm128_vm0, %v104_v46 }
  0x8b   :  { %969 = vmatprep.mubr.msk.f32.mxu0 %vm128_vm0, %v105_v47 }
  0x8e   :  { %970 = vmatmul.mubr.msk.f32.gmra.mrb[20].mxu0 %vm128_vm0, %v106_v48 }
  0x8f   :  { %972 = vmatprep.mubr.msk.f32.mxu0 %vm128_vm0, %v107_v49 }
  0x92   :  { %973 = vmatmul.mubr.msk.f32.gmra.mrb[22].mxu0 %vm128_vm0, %v108_v50 }
  0x93   :  { %975 = vmatprep.mubr.msk.f32.mxu0 %vm128_vm0, %v109_v51 }
  0x96   :  { %976 = vmatmul.mubr.msk.f32.gmra.mrb[24].mxu0 %vm128_vm0, %v110_v52 }
  0x97   :  { %978 = vmatprep.mubr.msk.f32.mxu0 %vm128_vm0, %v111_v53 }
  0x9a   :  { %979 = vmatmul.mubr.msk.f32.gmra.mrb[26].mxu0 %vm128_vm0, %v112_v54 }
  0x9b   :  { %981 = vmatprep.mubr.msk.f32.mxu0 %vm128_vm0, %v113_v55 }
  0x9e   :  { %982 = vmatmul.mubr.msk.f32.gmra.mrb[28].mxu0 %vm128_vm0, %v114_v56 }
  0x9f   :  { %984 = vmatprep.mubr.msk.f32.mxu0 %vm128_vm0, %v115_v57 }
  0xa2   :  { %985 = vmatmul.mubr.msk.f32.gmra.mrb[30].mxu0 %vm128_vm0, %v116_v58 }
 0x139   :  { %v941_v63 = vpop.f32.mrb[0].mxu0 }
 0x13a   :  { %v297_v0 = vadd.f32 %v941_v63, %v1417_v62  ;;  %v291_v1 = vpop.f32.mrb[1].mxu0 }
 0x13b   :  { %v292_v2 = vadd.f32 %v1417_v62, %v291_v1 }
 0x13c   :  { %v451_v5 = vmax.f32 %v297_v0, 0.0 }
 0x13d   :  { %v450_v3 = vmax.f32 %v292_v2, 0.0  ;;  %v944_v4 = vpop.f32.mrb[2].mxu0 }
 0x13e   :  { %v307_v6 = vadd.f32 %v944_v4, %v1417_v62  ;;  %v301_v7 = vpop.f32.mrb[3].mxu0 }
 0x13f   :  { %v302_v8 = vadd.f32 %v1417_v62, %v301_v7  ;;  %1019 = vmatprep.mubr.f32.mxu0 %v450_v3 }
 0x140   :  { %1020 = vmatmul.mubr.f32.vlgmr.msra.gmra.mrb[32].mxu0 %v451_v5  ;;  %v453_v11 = vmax.f32 %v307_v6, 0.0 }
 0x141   :  { %v452_v9 = vmax.f32 %v302_v8, 0.0  ;;  %v947_v10 = vpop.f32.mrb[4].mxu0 }
 0x142   :  { %v317_v12 = vadd.f32 %v947_v10, %v1417_v62  ;;  %v311_v13 = vpop.f32.mrb[5].mxu0 }
 0x143   :  { %v312_v14 = vadd.f32 %v1417_v62, %v311_v13  ;;  %1022 = vmatprep.mubr.f32.mxu0 %v452_v9 }
 0x144   :  { %1023 = vmatmul.mubr.f32.gmra.mrb[34].mxu0 %v453_v11  ;;  %v455_v17 = vmax.f32 %v317_v12, 0.0 }
 0x145   :  { %v454_v15 = vmax.f32 %v312_v14, 0.0  ;;  %v950_v16 = vpop.f32.mrb[6].mxu0 }
 0x146   :  { %v327_v18 = vadd.f32 %v950_v16, %v1417_v62  ;;  %v321_v19 = vpop.f32.mrb[7].mxu0 }
 0x147   :  { %1025 = vmatprep.mubr.f32.mxu0 %v454_v15  ;;  %v322_v20 = vadd.f32 %v1417_v62, %v321_v19 }
 0x148   :  { %1026 = vmatmul.mubr.f32.gmra.mrb[36].mxu0 %v455_v17  ;;  %v457_v23 = vmax.f32 %v327_v18, 0.0 }
 0x149   :  { %v953_v21 = vpop.f32.mrb[8].mxu0  ;;  %v456_v22 = vmax.f32 %v322_v20, 0.0 }
 0x14a   :  { %v337_v24 = vadd.f32 %v953_v21, %v1417_v62  ;;  %v331_v25 = vpop.f32.mrb[9].mxu0 }
 0x14b   :  { %v332_v26 = vadd.f32 %v1417_v62, %v331_v25  ;;  %1028 = vmatprep.mubr.f32.mxu1 %v456_v22 }
 0x14c   :  { %1029 = vmatmul.mubr.f32.vlgmr.msra.gmra.mrb[0].mxu1 %v457_v23  ;;  %v459_v29 = vmax.f32 %v337_v24, 0.0 }
 0x14d   :  { %v458_v27 = vmax.f32 %v332_v26, 0.0  ;;  %v956_v28 = vpop.f32.mrb[10].mxu0 }
 0x14e   :  { %v347_v30 = vadd.f32 %v956_v28, %v1417_v62  ;;  %v341_v31 = vpop.f32.mrb[11].mxu0 }
 0x14f   :  { %v342_v32 = vadd.f32 %v1417_v62, %v341_v31  ;;  %1031 = vmatprep.mubr.f32.mxu1 %v458_v27 }
 0x150   :  { %1032 = vmatmul.mubr.f32.gmra.mrb[2].mxu1 %v459_v29  ;;  %v461_v35 = vmax.f32 %v347_v30, 0.0 }
 0x151   :  { %v460_v33 = vmax.f32 %v342_v32, 0.0  ;;  %v959_v34 = vpop.f32.mrb[12].mxu0  ;;  %v1451_v32 = vld [vmem:[#allocation10] ss:$0 sm:$0xff] }
 0x152   :  { %v357_v36 = vadd.f32 %v959_v34, %v1417_v62  ;;  %v351_v37 = vpop.f32.mrb[13].mxu0 }
 0x153   :  { %v352_v38 = vadd.f32 %v1417_v62, %v351_v37  ;;  %1034 = vmatprep.mubr.f32.mxu1 %v460_v33 }
 0x154   :  { %1035 = vmatmul.mubr.f32.gmra.mrb[4].mxu1 %v461_v35  ;;  %v463_v41 = vmax.f32 %v357_v36, 0.0 }
 0x155   :  { %v462_v39 = vmax.f32 %v352_v38, 0.0  ;;  %v962_v40 = vpop.f32.mrb[14].mxu0 }
 0x156   :  { %v367_v42 = vadd.f32 %v962_v40, %v1417_v62  ;;  %v361_v43 = vpop.f32.mrb[15].mxu0 }
 0x157   :  { %v362_v44 = vadd.f32 %v1417_v62, %v361_v43  ;;  %1037 = vmatprep.mubr.f32.mxu1 %v462_v39 }
 0x158   :  { %1038 = vmatmul.mubr.f32.gmra.mrb[6].mxu1 %v463_v41  ;;  %v465_v47 = vmax.f32 %v367_v42, 0.0 }
 0x159   :  { %v464_v45 = vmax.f32 %v362_v44, 0.0  ;;  %v965_v46 = vpop.f32.mrb[16].mxu0 }
 0x15a   :  { %v377_v48 = vadd.f32 %v965_v46, %v1417_v62  ;;  %v371_v49 = vpop.f32.mrb[17].mxu0 }
 0x15b   :  { %v372_v50 = vadd.f32 %v1417_v62, %v371_v49  ;;  %1040 = vmatprep.mubr.f32.mxu1 %v464_v45 }
 0x15c   :  { %1041 = vmatmul.mubr.f32.gmra.mrb[8].mxu1 %v465_v47  ;;  %v467_v53 = vmax.f32 %v377_v48, 0.0 }
 0x15d   :  { %v466_v51 = vmax.f32 %v372_v50, 0.0  ;;  %v968_v52 = vpop.f32.mrb[18].mxu0 }
 0x15e   :  { %v387_v54 = vadd.f32 %v968_v52, %v1417_v62  ;;  %v381_v55 = vpop.f32.mrb[19].mxu0 }
 0x15f   :  { %v382_v56 = vadd.f32 %v1417_v62, %v381_v55  ;;  %1043 = vmatprep.mubr.f32.mxu1 %v466_v51 }
 0x160   :  { %1044 = vmatmul.mubr.f32.gmra.mrb[10].mxu1 %v467_v53  ;;  %v469_v59 = vmax.f32 %v387_v54, 0.0 }
 0x161   :  { %v468_v57 = vmax.f32 %v382_v56, 0.0  ;;  %v971_v58 = vpop.f32.mrb[20].mxu0 }
 0x162   :  { %v397_v60 = vadd.f32 %v971_v58, %v1417_v62  ;;  %v391_v61 = vpop.f32.mrb[21].mxu0 }
 0x163   :  { %v392_v63 = vadd.f32 %v1417_v62, %v391_v61  ;;  %1046 = vmatprep.mubr.f32.mxu1 %v468_v57 }
 0x164   :  { %1047 = vmatmul.mubr.f32.gmra.mrb[12].mxu1 %v469_v59  ;;  %v471_v2 = vmax.f32 %v397_v60, 0.0 }
 0x165   :  { %v470_v0 = vmax.f32 %v392_v63, 0.0  ;;  %v974_v1 = vpop.f32.mrb[22].mxu0 }
 0x166   :  { %v407_v3 = vadd.f32 %v974_v1, %v1417_v62  ;;  %v401_v4 = vpop.f32.mrb[23].mxu0 }
 0x167   :  { %v402_v5 = vadd.f32 %v1417_v62, %v401_v4  ;;  %1049 = vmatprep.mubr.f32.mxu1 %v470_v0 }
 0x168   :  { %1050 = vmatmul.mubr.f32.gmra.mrb[14].mxu1 %v471_v2  ;;  %v473_v8 = vmax.f32 %v407_v3, 0.0 }
 0x169   :  { %v472_v6 = vmax.f32 %v402_v5, 0.0  ;;  %v977_v7 = vpop.f32.mrb[24].mxu0 }
 0x16a   :  { %v417_v9 = vadd.f32 %v977_v7, %v1417_v62  ;;  %v411_v10 = vpop.f32.mrb[25].mxu0 }
 0x16b   :  { %v412_v11 = vadd.f32 %v1417_v62, %v411_v10  ;;  %1052 = vmatprep.mubr.f32.mxu1 %v472_v6 }
 0x16c   :  { %1053 = vmatmul.mubr.f32.gmra.mrb[16].mxu1 %v473_v8  ;;  %v475_v14 = vmax.f32 %v417_v9, 0.0 }
 0x16d   :  { %v474_v12 = vmax.f32 %v412_v11, 0.0  ;;  %v980_v13 = vpop.f32.mrb[26].mxu0 }
 0x16e   :  { %v427_v15 = vadd.f32 %v980_v13, %v1417_v62  ;;  %v421_v16 = vpop.f32.mrb[27].mxu0 }
 0x16f   :  { %v422_v17 = vadd.f32 %v1417_v62, %v421_v16  ;;  %1055 = vmatprep.mubr.f32.mxu1 %v474_v12 }
 0x170   :  { %1056 = vmatmul.mubr.f32.gmra.mrb[18].mxu1 %v475_v14  ;;  %v477_v20 = vmax.f32 %v427_v15, 0.0 }
 0x171   :  { %v476_v18 = vmax.f32 %v422_v17, 0.0  ;;  %v983_v19 = vpop.f32.mrb[28].mxu0 }
 0x172   :  { %v437_v21 = vadd.f32 %v983_v19, %v1417_v62  ;;  %v431_v22 = vpop.f32.mrb[29].mxu0 }
 0x173   :  { %v432_v23 = vadd.f32 %v1417_v62, %v431_v22  ;;  %1058 = vmatprep.mubr.f32.mxu1 %v476_v18 }
 0x174   :  { %1059 = vmatmul.mubr.f32.gmra.mrb[20].mxu1 %v477_v20  ;;  %v479_v26 = vmax.f32 %v437_v21, 0.0 }
 0x175   :  { %v478_v24 = vmax.f32 %v432_v23, 0.0  ;;  %v986_v25 = vpop.f32.mrb[30].mxu0 }
 0x176   :  { %v447_v27 = vadd.f32 %v986_v25, %v1417_v62  ;;  %v441_v28 = vpop.f32.mrb[31].mxu0 }
 0x177   :  { %v442_v29 = vadd.f32 %v1417_v62, %v441_v28  ;;  %1061 = vmatprep.mubr.f32.mxu1 %v478_v24 }
 0x178   :  { %1062 = vmatmul.mubr.f32.gmra.mrb[22].mxu1 %v479_v26  ;;  %v481_v31 = vmax.f32 %v447_v27, 0.0 }
 0x179   :  { %v480_v30 = vmax.f32 %v442_v29, 0.0 }
 0x17b   :  { %1064 = vmatprep.mubr.f32.mxu1 %v480_v30 }
 0x17c   :  { %1065 = vmatmul.mubr.f32.gmra.mrb[24].mxu1 %v481_v31 }
 0x213   :  { %v1021_v33 = vpop.f32.mrb[32].mxu0 }
 0x214   :  { %v577_v34 = vadd.f32 %v1021_v33, %v1451_v32  ;;  %v571_v35 = vpop.f32.mrb[33].mxu0 }
 0x215   :  { %v572_v36 = vadd.f32 %v1451_v32, %v571_v35 }
 0x216   :  { %v731_v37 = vmax.f32 %v577_v34, 0.0 }
 0x217   :  { %v730_v38 = vmax.f32 %v572_v36, 0.0  ;;  %v1024_v39 = vpop.f32.mrb[34].mxu0 }
 0x218   :  { %763 = vst [vmem:[#allocation11 + $0x8] sm:$0xff] %v731_v37  ;;  %v587_v62 = vadd.f32 %v1024_v39, %v1451_v32  ;;  %v581_v40 = vpop.f32.mrb[35].mxu0 }
 0x219   :  { %762 = vst [vmem:[#allocation11] sm:$0xff] %v730_v38  ;;  %v582_v41 = vadd.f32 %v1451_v32, %v581_v40 }
 0x21a   :  { %v733_v42 = vmax.f32 %v587_v62, 0.0 }
 0x21b   :  { %v732_v43 = vmax.f32 %v582_v41, 0.0  ;;  %v1027_v44 = vpop.f32.mrb[36].mxu0 }
 0x21c   :  { %765 = vst [vmem:[#allocation11 + $0x18] sm:$0xff] %v733_v42  ;;  %v597_v45 = vadd.f32 %v1027_v44, %v1451_v32  ;;  %v591_v46 = vpop.f32.mrb[37].mxu0 }
 0x21d   :  { %764 = vst [vmem:[#allocation11 + $0x10] sm:$0xff] %v732_v43  ;;  %v592_v47 = vadd.f32 %v1451_v32, %v591_v46 }
 0x21e   :  { %v735_v48 = vmax.f32 %v597_v45, 0.0 }
 0x21f   :  { %v734_v49 = vmax.f32 %v592_v47, 0.0  ;;  %v1030_v50 = vpop.f32.mrb[0].mxu1 }
 0x220   :  { %767 = vst [vmem:[#allocation11 + $0x28] sm:$0xff] %v735_v48  ;;  %v607_v51 = vadd.f32 %v1030_v50, %v1451_v32  ;;  %v601_v52 = vpop.f32.mrb[1].mxu1 }
 0x221   :  { %766 = vst [vmem:[#allocation11 + $0x20] sm:$0xff] %v734_v49  ;;  %v602_v53 = vadd.f32 %v1451_v32, %v601_v52 }
 0x222   :  { %v737_v54 = vmax.f32 %v607_v51, 0.0 }
 0x223   :  { %v736_v55 = vmax.f32 %v602_v53, 0.0  ;;  %v1033_v56 = vpop.f32.mrb[2].mxu1 }
 0x224   :  { %769 = vst [vmem:[#allocation11 + $0x38] sm:$0xff] %v737_v54  ;;  %v617_v57 = vadd.f32 %v1033_v56, %v1451_v32  ;;  %v611_v58 = vpop.f32.mrb[3].mxu1 }
 0x225   :  { %768 = vst [vmem:[#allocation11 + $0x30] sm:$0xff] %v736_v55  ;;  %v612_v59 = vadd.f32 %v1451_v32, %v611_v58 }
 0x226   :  { %v739_v60 = vmax.f32 %v617_v57, 0.0 }
 0x227   :  { %v738_v61 = vmax.f32 %v612_v59, 0.0  ;;  %v1036_v63 = vpop.f32.mrb[4].mxu1 }
 0x228   :  { %771 = vst [vmem:[#allocation11 + $0x48] sm:$0xff] %v739_v60  ;;  %v627_v0 = vadd.f32 %v1036_v63, %v1451_v32  ;;  %v621_v1 = vpop.f32.mrb[5].mxu1 }
 0x229   :  { %770 = vst [vmem:[#allocation11 + $0x40] sm:$0xff] %v738_v61  ;;  %v622_v2 = vadd.f32 %v1451_v32, %v621_v1 }
 0x22a   :  { %v741_v3 = vmax.f32 %v627_v0, 0.0 }
 0x22b   :  { %v740_v4 = vmax.f32 %v622_v2, 0.0  ;;  %v1039_v5 = vpop.f32.mrb[6].mxu1 }
 0x22c   :  { %773 = vst [vmem:[#allocation11 + $0x58] sm:$0xff] %v741_v3  ;;  %v637_v6 = vadd.f32 %v1039_v5, %v1451_v32  ;;  %v631_v7 = vpop.f32.mrb[7].mxu1 }
 0x22d   :  { %772 = vst [vmem:[#allocation11 + $0x50] sm:$0xff] %v740_v4  ;;  %v632_v8 = vadd.f32 %v1451_v32, %v631_v7 }
 0x22e   :  { %v743_v9 = vmax.f32 %v637_v6, 0.0 }
 0x22f   :  { %v742_v10 = vmax.f32 %v632_v8, 0.0  ;;  %v1042_v11 = vpop.f32.mrb[8].mxu1 }
 0x230   :  { %775 = vst [vmem:[#allocation11 + $0x68] sm:$0xff] %v743_v9  ;;  %v647_v12 = vadd.f32 %v1042_v11, %v1451_v32  ;;  %v641_v13 = vpop.f32.mrb[9].mxu1 }
 0x231   :  { %774 = vst [vmem:[#allocation11 + $0x60] sm:$0xff] %v742_v10  ;;  %v642_v14 = vadd.f32 %v1451_v32, %v641_v13 }
 0x232   :  { %v745_v15 = vmax.f32 %v647_v12, 0.0 }
 0x233   :  { %v744_v16 = vmax.f32 %v642_v14, 0.0  ;;  %v1045_v17 = vpop.f32.mrb[10].mxu1 }
 0x234   :  { %777 = vst [vmem:[#allocation11 + $0x78] sm:$0xff] %v745_v15  ;;  %v657_v18 = vadd.f32 %v1045_v17, %v1451_v32  ;;  %v651_v19 = vpop.f32.mrb[11].mxu1 }
 0x235   :  { %776 = vst [vmem:[#allocation11 + $0x70] sm:$0xff] %v744_v16  ;;  %v652_v20 = vadd.f32 %v1451_v32, %v651_v19 }
 0x236   :  { %v747_v21 = vmax.f32 %v657_v18, 0.0 }
 0x237   :  { %v746_v22 = vmax.f32 %v652_v20, 0.0  ;;  %v1048_v23 = vpop.f32.mrb[12].mxu1 }
 0x238   :  { %779 = vst [vmem:[#allocation11 + $0x88] sm:$0xff] %v747_v21  ;;  %v667_v24 = vadd.f32 %v1048_v23, %v1451_v32  ;;  %v661_v25 = vpop.f32.mrb[13].mxu1 }
 0x239   :  { %778 = vst [vmem:[#allocation11 + $0x80] sm:$0xff] %v746_v22  ;;  %v662_v26 = vadd.f32 %v1451_v32, %v661_v25 }
 0x23a   :  { %v749_v27 = vmax.f32 %v667_v24, 0.0 }
 0x23b   :  { %v748_v28 = vmax.f32 %v662_v26, 0.0  ;;  %v1051_v29 = vpop.f32.mrb[14].mxu1 }
 0x23c   :  { %781 = vst [vmem:[#allocation11 + $0x98] sm:$0xff] %v749_v27  ;;  %v677_v30 = vadd.f32 %v1051_v29, %v1451_v32  ;;  %v671_v31 = vpop.f32.mrb[15].mxu1 }
 0x23d   :  { %780 = vst [vmem:[#allocation11 + $0x90] sm:$0xff] %v748_v28  ;;  %v672_v33 = vadd.f32 %v1451_v32, %v671_v31 }
 0x23e   :  { %v751_v34 = vmax.f32 %v677_v30, 0.0 }
 0x23f   :  { %v750_v35 = vmax.f32 %v672_v33, 0.0  ;;  %v1054_v36 = vpop.f32.mrb[16].mxu1 }
 0x240   :  { %783 = vst [vmem:[#allocation11 + $0xa8] sm:$0xff] %v751_v34  ;;  %v687_v37 = vadd.f32 %v1054_v36, %v1451_v32  ;;  %v681_v38 = vpop.f32.mrb[17].mxu1 }
 0x241   :  { %782 = vst [vmem:[#allocation11 + $0xa0] sm:$0xff] %v750_v35  ;;  %v682_v39 = vadd.f32 %v1451_v32, %v681_v38 }
 0x242   :  { %v753_v62 = vmax.f32 %v687_v37, 0.0 }
 0x243   :  { %v752_v40 = vmax.f32 %v682_v39, 0.0  ;;  %v1057_v41 = vpop.f32.mrb[18].mxu1 }
 0x244   :  { %785 = vst [vmem:[#allocation11 + $0xb8] sm:$0xff] %v753_v62  ;;  %v697_v42 = vadd.f32 %v1057_v41, %v1451_v32  ;;  %v691_v43 = vpop.f32.mrb[19].mxu1 }
 0x245   :  { %784 = vst [vmem:[#allocation11 + $0xb0] sm:$0xff] %v752_v40  ;;  %v692_v44 = vadd.f32 %v1451_v32, %v691_v43 }
 0x246   :  { %v755_v45 = vmax.f32 %v697_v42, 0.0 }
 0x247   :  { %v754_v46 = vmax.f32 %v692_v44, 0.0  ;;  %v1060_v47 = vpop.f32.mrb[20].mxu1 }
 0x248   :  { %787 = vst [vmem:[#allocation11 + $0xc8] sm:$0xff] %v755_v45  ;;  %v707_v48 = vadd.f32 %v1060_v47, %v1451_v32  ;;  %v701_v49 = vpop.f32.mrb[21].mxu1 }
 0x249   :  { %786 = vst [vmem:[#allocation11 + $0xc0] sm:$0xff] %v754_v46  ;;  %v702_v50 = vadd.f32 %v1451_v32, %v701_v49 }
 0x24a   :  { %v757_v51 = vmax.f32 %v707_v48, 0.0 }
 0x24b   :  { %v756_v52 = vmax.f32 %v702_v50, 0.0  ;;  %v1063_v53 = vpop.f32.mrb[22].mxu1 }
 0x24c   :  { %789 = vst [vmem:[#allocation11 + $0xd8] sm:$0xff] %v757_v51  ;;  %v717_v54 = vadd.f32 %v1063_v53, %v1451_v32  ;;  %v711_v55 = vpop.f32.mrb[23].mxu1 }
 0x24d   :  { %788 = vst [vmem:[#allocation11 + $0xd0] sm:$0xff] %v756_v52  ;;  %v712_v56 = vadd.f32 %v1451_v32, %v711_v55 }
 0x24e   :  { %v759_v57 = vmax.f32 %v717_v54, 0.0 }
 0x24f   :  { %v758_v58 = vmax.f32 %v712_v56, 0.0  ;;  %v1066_v59 = vpop.f32.mrb[24].mxu1 }
 0x250   :  { %791 = vst [vmem:[#allocation11 + $0xe8] sm:$0xff] %v759_v57  ;;  %v727_v60 = vadd.f32 %v1066_v59, %v1451_v32  ;;  %v721_v61 = vpop.f32.mrb[25].mxu1 }
 0x251   :  { %790 = vst [vmem:[#allocation11 + $0xe0] sm:$0xff] %v758_v58  ;;  %v722_v63 = vadd.f32 %v1451_v32, %v721_v61 }
 0x252   :  { %v761_v0 = vmax.f32 %v727_v60, 0.0 }
 0x253   :  { %v760_v1 = vmax.f32 %v722_v63, 0.0 }
 0x254   :  { %793 = vst [vmem:[#allocation11 + $0xf8] sm:$0xff] %v761_v0 }
 0x255   :  { %792 = vst [vmem:[#allocation11 + $0xf0] sm:$0xff] %v760_v1 }
 0x256   :  { %1252 = shalt.err (!%p1249_p2)
}
 0x257   :  { %s1253_s9 = scalar_lea.hbm %s1505_s5, 4096 }
 0x258   :  { %p1254_p3 = scmp.ne.s32.totalorder %s1505_s5, %s1253_s9  ;;  %p1257_p4 = scmp.lt.u32.totalorder %s1253_s9, %s1505_s5 }
 0x25a   :  { %p1259_p5 = pnand %p1257_p4, %p1254_p3 }
 0x25c   :  { %1262 = shalt.err (!%p1259_p5)
}
 0x25d   :  { %805 = dma.vmem_to_hbm [thread:$0]  %s800_s3, 4096, %s1505_s5, [#allocation4], %s1273_s30, %s1273_s30, %s1274_s6  }
 0x25e   :  { %1269 = dma.done.wait [#allocation4], 4096  }
 0x25f   :  { %1270 = vsyncadd [#allocation4], 4294963200 }
 0x260   :  { %809 = vsyncpa [#allocation3], 1 }
 0x261   :  { %810 = vsyncpa [#allocation6], 1 }
 0x262   :  { %811 = vsyncpa [#allocation9], 1 }
 0x263   :  { %812 = vsyncpa [#allocation4], 1 }

</bundles_post_ra>
